<compile_context>
chip_gen: v6e
topology: v6e:2x2x1
jax: 0.10.0
libtpu: 0.0.40
codegen_flags: <defaults>
</compile_context>

<pallas_src>
import functools
import math

import jax
import jax.numpy as jnp
from jax import lax
from jax.experimental import pallas as pl
from jax.experimental.pallas import tpu as pltpu


# ------------------------------ Pallas kernel ------------------------------ #

def fused_attention_kernel(x_ref, wqkv_ref, wout_ref, bout_ref, o_ref,
                           *, heads, d, scale):
    """One batch element per grid step; all heads + both projections fused.

    x_ref    : (1, N, dim)      input tokens for this batch element
    wqkv_ref : (dim, 3*inner)   to_qkv weight (no bias)
    wout_ref : (inner, dim)     to_out weight
    bout_ref : (1, dim)         to_out bias
    o_ref    : (1, N, dim)      output
    """
    inner = heads * d
    x = x_ref[0].astype(jnp.float32)                       # (N, dim)

    # --- to_qkv (no bias), single MXU matmul, stays in VMEM ---
    qkv = jnp.dot(x, wqkv_ref[...].astype(jnp.float32),
                  preferred_element_type=jnp.float32)      # (N, 3*inner)

    # --- per-head scaled-dot-product attention (unrolled over heads) ---
    head_outs = []
    for h in range(heads):
        # Static lane slices of the fused qkv block (no HBM traffic).
        q = qkv[:, h * d:(h + 1) * d] * scale              # scale folded into q
        k = qkv[:, inner + h * d: inner + (h + 1) * d]
        v = qkv[:, 2 * inner + h * d: 2 * inner + (h + 1) * d]

        # scores = q @ k^T without materializing a transpose:
        # contract on the d axis directly.
        s = lax.dot_general(q, k, (((1,), (1,)), ((), ())),
                            preferred_element_type=jnp.float32)   # (N, N)

        # numerically-stable softmax; reciprocal on the EUP (approx) slot
        s = s - jnp.max(s, axis=-1, keepdims=True)
        p = jnp.exp(s)
        p = p * pl.reciprocal(jnp.sum(p, axis=-1, keepdims=True), approx=True)

        head_outs.append(jnp.dot(p, v, preferred_element_type=jnp.float32))

    attn_out = jnp.concatenate(head_outs, axis=-1)          # (N, inner)

    # --- to_out (with bias), fused; lane-dense (N, dim) store ---
    y = jnp.dot(attn_out, wout_ref[...].astype(jnp.float32),
                preferred_element_type=jnp.float32)
    y = y + bout_ref[...].astype(jnp.float32)               # (1, dim) broadcast
    o_ref[0] = y.astype(o_ref.dtype)


# ------------------------------ Host wrapper ------------------------------- #

def standard_attention_forward(x, params, heads, H, W):
    """Pallas implementation of StandardAttention.forward(x, H, W).

    x: (B, N, dim) with N == H * W.
    params: dict with 'w_qkv' (dim, 3*inner), 'w_out' (inner, dim), 'b_out' (dim,)
    """
    del H, W  # unused by the math, kept for API parity with the PyTorch module
    B, N, dim = x.shape
    w_qkv = params["w_qkv"]
    w_out = params["w_out"]
    b_out = params["b_out"]
    inner3 = w_qkv.shape[1]
    inner_dim = inner3 // 3
    d = inner_dim // heads
    scale = d ** (-0.5)

    kernel = functools.partial(fused_attention_kernel,
                               heads=heads, d=d, scale=scale)

    out = pl.pallas_call(
        kernel,
        out_shape=jax.ShapeDtypeStruct((B, N, dim), x.dtype),
        grid=(B,),
        in_specs=[
            pl.BlockSpec((1, N, dim), lambda b: (b, 0, 0)),        # x (per batch)
            pl.BlockSpec((dim, inner3), lambda b: (0, 0)),         # w_qkv (resident)
            pl.BlockSpec((inner_dim, dim), lambda b: (0, 0)),      # w_out (resident)
            pl.BlockSpec((1, dim), lambda b: (0, 0)),              # b_out (resident)
        ],
        out_specs=pl.BlockSpec((1, N, dim), lambda b: (b, 0, 0)),
        compiler_params=pltpu.CompilerParams(
            dimension_semantics=("parallel",)),
    )(x, w_qkv, w_out, b_out.reshape(1, dim))

    return out


# ------------------------------ Reference (JAX) ----------------------------- #

def standard_attention_reference(x, params, heads, H, W):
    del H, W
    B, N, dim = x.shape
    w_qkv, w_out, b_out = params["w_qkv"], params["w_out"], params["b_out"]
    inner_dim = w_qkv.shape[1] // 3
    d = inner_dim // heads
    scale = d ** (-0.5)

    qkv = x @ w_qkv
    q, k, v = jnp.split(qkv, 3, axis=-1)

    def to_bhnd(t):
        return t.reshape(B, N, heads, d).transpose(0, 2, 1, 3)

    q, k, v = to_bhnd(q), to_bhnd(k), to_bhnd(v)
    dots = jnp.einsum("bhid,bhjd->bhij", q, k) * scale
    attn = jax.nn.softmax(dots, axis=-1)
    out = jnp.einsum("bhij,bhjd->bhid", attn, v)
    out = out.transpose(0, 2, 1, 3).reshape(B, N, inner_dim)
    return out @ w_out + b_out


# ----------------------------------- Main ----------------------------------- #

if __name__ == "__main__":
    # Small, module-consistent shapes.
    B = 2
    dim = 32
    heads = 4
    dim_head = 8
    inner_dim = heads * dim_head   # 32
    Himg, Wimg = 4, 4
    N = Himg * Wimg                # 16 tokens

    key = jax.random.PRNGKey(0)
    kx, kqkv, kwo, kbo = jax.random.split(key, 4)

    x = jax.random.normal(kx, (B, N, dim), dtype=jnp.float32)

    # Deterministic synthetic parameters (nn.Linear-style uniform init).
    lim_qkv = 1.0 / math.sqrt(dim)
    lim_out = 1.0 / math.sqrt(inner_dim)
    params = {
        # to_qkv: Linear(dim, inner_dim*3, bias=False); stored as (in, out)
        "w_qkv": jax.random.uniform(kqkv, (dim, 3 * inner_dim), jnp.float32,
                                    -lim_qkv, lim_qkv),
        # to_out: Linear(inner_dim, dim) with bias; stored as (in, out)
        "w_out": jax.random.uniform(kwo, (inner_dim, dim), jnp.float32,
                                    -lim_out, lim_out),
        "b_out": jax.random.uniform(kbo, (dim,), jnp.float32,
                                    -lim_out, lim_out),
    }

    out = standard_attention_forward(x, params, heads, Himg, Wimg)
    out = jax.block_until_ready(out)

    ref = standard_attention_reference(x, params, heads, Himg, Wimg)
    assert out.shape == (B, N, dim), out.shape
    # Tolerance loosened slightly vs. exact-f32 (approx EUP reciprocal in the
    # softmax denominator); still tight enough to catch real bugs.
    assert jnp.allclose(out, ref, atol=1e-3, rtol=1e-3), (
        float(jnp.max(jnp.abs(out - ref))))

    print("KERNEL_OK")
</pallas_src>

<mosaic_0001>
module attributes {stable_mosaic.version = 11 : i64} {
  func.func @fused_attention_kernel(%arg0: i32, %arg1: memref<1x16x32xf32, #tpu.memory_space<vmem>>, %arg2: memref<32x96xf32, #tpu.memory_space<vmem>>, %arg3: memref<32x32xf32, #tpu.memory_space<vmem>>, %arg4: memref<1x32xf32, #tpu.memory_space<vmem>>, %arg5: memref<1x16x32xf32, #tpu.memory_space<vmem>>) attributes {dimension_semantics = [#tpu.dimension_semantics<parallel>], iteration_bounds = array<i64: 2>, scalar_prefetch = 0 : i64, scratch_operands = 0 : i64, tpu.core_type = #tpu.core_type<tc>, window_params = [{transform_indices = @transform_0, window_bounds = array<i64: 1, 16, 32>}, {pipeline_mode = #tpu.pipeline_mode<synchronous>, transform_indices = @transform_1, window_bounds = array<i64: 32, 96>}, {pipeline_mode = #tpu.pipeline_mode<synchronous>, transform_indices = @transform_2, window_bounds = array<i64: 32, 32>}, {pipeline_mode = #tpu.pipeline_mode<synchronous>, transform_indices = @transform_3, window_bounds = array<i64: 1, 32>}, {transform_indices = @transform_4, window_bounds = array<i64: 1, 16, 32>}]} {
    %c0 = arith.constant 0 : index
    %c0_0 = arith.constant 0 : index
    %c0_1 = arith.constant 0 : index
    %0 = vector.load %arg1[%c0, %c0_0, %c0_1] : memref<1x16x32xf32, #tpu.memory_space<vmem>>, vector<1x16x32xf32>
    %1 = vector.shape_cast %0 : vector<1x16x32xf32> to vector<16x32xf32>
    %c0_2 = arith.constant 0 : index
    %c0_3 = arith.constant 0 : index
    %2 = vector.load %arg2[%c0_2, %c0_3] : memref<32x96xf32, #tpu.memory_space<vmem>>, vector<32x96xf32>
    %cst = arith.constant dense<0.000000e+00> : vector<16x96xf32>
    %3 = tpu.matmul %1, %2, %cst {dimension_numbers = #tpu.dot_dimension_numbers<[1], [0], [0], [1], [0, 0, 1, 1], [], []>} : vector<16x32xf32>, vector<32x96xf32>, vector<16x96xf32> -> vector<16x96xf32>
    %4 = vector.extract_strided_slice %3 {offsets = [0, 0], sizes = [16, 8], strides = [1, 1]} : vector<16x96xf32> to vector<16x8xf32>
    %cst_4 = arith.constant 0.353553385 : f32
    %5 = vector.broadcast %cst_4 : f32 to vector<16x8xf32>
    %6 = arith.mulf %4, %5 : vector<16x8xf32>
    %7 = vector.extract_strided_slice %3 {offsets = [0, 32], sizes = [16, 8], strides = [1, 1]} : vector<16x96xf32> to vector<16x8xf32>
    %8 = vector.extract_strided_slice %3 {offsets = [0, 64], sizes = [16, 8], strides = [1, 1]} : vector<16x96xf32> to vector<16x8xf32>
    %cst_5 = arith.constant dense<0.000000e+00> : vector<16x16xf32>
    %9 = tpu.matmul %6, %7, %cst_5 {dimension_numbers = #tpu.dot_dimension_numbers<[1], [1], [0], [0], [0, 0, 1, 0], [], []>} : vector<16x8xf32>, vector<16x8xf32>, vector<16x16xf32> -> vector<16x16xf32>
    %cst_6 = arith.constant dense<0xFF800000> : vector<16xf32>
    %10 = vector.multi_reduction <maximumf>, %9, %cst_6 [1] : vector<16x16xf32> to vector<16xf32>
    %11 = vector.shape_cast %10 : vector<16xf32> to vector<16x1xf32>
    %12 = vector.broadcast %11 : vector<16x1xf32> to vector<16x16xf32>
    %13 = arith.subf %9, %12 : vector<16x16xf32>
    %14 = math.exp %13 : vector<16x16xf32>
    %cst_7 = arith.constant dense<0.000000e+00> : vector<16xf32>
    %15 = vector.multi_reduction <add>, %14, %cst_7 [1] : vector<16x16xf32> to vector<16xf32>
    %16 = vector.shape_cast %15 : vector<16xf32> to vector<16x1xf32>
    %17 = tpu.reciprocal %16 {approx = true} : vector<16x1xf32> -> vector<16x1xf32>
    %18 = vector.broadcast %17 : vector<16x1xf32> to vector<16x16xf32>
    %19 = arith.mulf %14, %18 : vector<16x16xf32>
    %cst_8 = arith.constant dense<0.000000e+00> : vector<16x8xf32>
    %20 = tpu.matmul %19, %8, %cst_8 {dimension_numbers = #tpu.dot_dimension_numbers<[1], [0], [0], [1], [0, 0, 1, 1], [], []>} : vector<16x16xf32>, vector<16x8xf32>, vector<16x8xf32> -> vector<16x8xf32>
    %21 = vector.extract_strided_slice %3 {offsets = [0, 8], sizes = [16, 8], strides = [1, 1]} : vector<16x96xf32> to vector<16x8xf32>
    %cst_9 = arith.constant 0.353553385 : f32
    %22 = vector.broadcast %cst_9 : f32 to vector<16x8xf32>
    %23 = arith.mulf %21, %22 : vector<16x8xf32>
    %24 = vector.extract_strided_slice %3 {offsets = [0, 40], sizes = [16, 8], strides = [1, 1]} : vector<16x96xf32> to vector<16x8xf32>
    %25 = vector.extract_strided_slice %3 {offsets = [0, 72], sizes = [16, 8], strides = [1, 1]} : vector<16x96xf32> to vector<16x8xf32>
    %cst_10 = arith.constant dense<0.000000e+00> : vector<16x16xf32>
    %26 = tpu.matmul %23, %24, %cst_10 {dimension_numbers = #tpu.dot_dimension_numbers<[1], [1], [0], [0], [0, 0, 1, 0], [], []>} : vector<16x8xf32>, vector<16x8xf32>, vector<16x16xf32> -> vector<16x16xf32>
    %cst_11 = arith.constant dense<0xFF800000> : vector<16xf32>
    %27 = vector.multi_reduction <maximumf>, %26, %cst_11 [1] : vector<16x16xf32> to vector<16xf32>
    %28 = vector.shape_cast %27 : vector<16xf32> to vector<16x1xf32>
    %29 = vector.broadcast %28 : vector<16x1xf32> to vector<16x16xf32>
    %30 = arith.subf %26, %29 : vector<16x16xf32>
    %31 = math.exp %30 : vector<16x16xf32>
    %cst_12 = arith.constant dense<0.000000e+00> : vector<16xf32>
    %32 = vector.multi_reduction <add>, %31, %cst_12 [1] : vector<16x16xf32> to vector<16xf32>
    %33 = vector.shape_cast %32 : vector<16xf32> to vector<16x1xf32>
    %34 = tpu.reciprocal %33 {approx = true} : vector<16x1xf32> -> vector<16x1xf32>
    %35 = vector.broadcast %34 : vector<16x1xf32> to vector<16x16xf32>
    %36 = arith.mulf %31, %35 : vector<16x16xf32>
    %cst_13 = arith.constant dense<0.000000e+00> : vector<16x8xf32>
    %37 = tpu.matmul %36, %25, %cst_13 {dimension_numbers = #tpu.dot_dimension_numbers<[1], [0], [0], [1], [0, 0, 1, 1], [], []>} : vector<16x16xf32>, vector<16x8xf32>, vector<16x8xf32> -> vector<16x8xf32>
    %38 = vector.extract_strided_slice %3 {offsets = [0, 16], sizes = [16, 8], strides = [1, 1]} : vector<16x96xf32> to vector<16x8xf32>
    %cst_14 = arith.constant 0.353553385 : f32
    %39 = vector.broadcast %cst_14 : f32 to vector<16x8xf32>
    %40 = arith.mulf %38, %39 : vector<16x8xf32>
    %41 = vector.extract_strided_slice %3 {offsets = [0, 48], sizes = [16, 8], strides = [1, 1]} : vector<16x96xf32> to vector<16x8xf32>
    %42 = vector.extract_strided_slice %3 {offsets = [0, 80], sizes = [16, 8], strides = [1, 1]} : vector<16x96xf32> to vector<16x8xf32>
    %cst_15 = arith.constant dense<0.000000e+00> : vector<16x16xf32>
    %43 = tpu.matmul %40, %41, %cst_15 {dimension_numbers = #tpu.dot_dimension_numbers<[1], [1], [0], [0], [0, 0, 1, 0], [], []>} : vector<16x8xf32>, vector<16x8xf32>, vector<16x16xf32> -> vector<16x16xf32>
    %cst_16 = arith.constant dense<0xFF800000> : vector<16xf32>
    %44 = vector.multi_reduction <maximumf>, %43, %cst_16 [1] : vector<16x16xf32> to vector<16xf32>
    %45 = vector.shape_cast %44 : vector<16xf32> to vector<16x1xf32>
    %46 = vector.broadcast %45 : vector<16x1xf32> to vector<16x16xf32>
    %47 = arith.subf %43, %46 : vector<16x16xf32>
    %48 = math.exp %47 : vector<16x16xf32>
    %cst_17 = arith.constant dense<0.000000e+00> : vector<16xf32>
    %49 = vector.multi_reduction <add>, %48, %cst_17 [1] : vector<16x16xf32> to vector<16xf32>
    %50 = vector.shape_cast %49 : vector<16xf32> to vector<16x1xf32>
    %51 = tpu.reciprocal %50 {approx = true} : vector<16x1xf32> -> vector<16x1xf32>
    %52 = vector.broadcast %51 : vector<16x1xf32> to vector<16x16xf32>
    %53 = arith.mulf %48, %52 : vector<16x16xf32>
    %cst_18 = arith.constant dense<0.000000e+00> : vector<16x8xf32>
    %54 = tpu.matmul %53, %42, %cst_18 {dimension_numbers = #tpu.dot_dimension_numbers<[1], [0], [0], [1], [0, 0, 1, 1], [], []>} : vector<16x16xf32>, vector<16x8xf32>, vector<16x8xf32> -> vector<16x8xf32>
    %55 = vector.extract_strided_slice %3 {offsets = [0, 24], sizes = [16, 8], strides = [1, 1]} : vector<16x96xf32> to vector<16x8xf32>
    %cst_19 = arith.constant 0.353553385 : f32
    %56 = vector.broadcast %cst_19 : f32 to vector<16x8xf32>
    %57 = arith.mulf %55, %56 : vector<16x8xf32>
    %58 = vector.extract_strided_slice %3 {offsets = [0, 56], sizes = [16, 8], strides = [1, 1]} : vector<16x96xf32> to vector<16x8xf32>
    %59 = vector.extract_strided_slice %3 {offsets = [0, 88], sizes = [16, 8], strides = [1, 1]} : vector<16x96xf32> to vector<16x8xf32>
    %cst_20 = arith.constant dense<0.000000e+00> : vector<16x16xf32>
    %60 = tpu.matmul %57, %58, %cst_20 {dimension_numbers = #tpu.dot_dimension_numbers<[1], [1], [0], [0], [0, 0, 1, 0], [], []>} : vector<16x8xf32>, vector<16x8xf32>, vector<16x16xf32> -> vector<16x16xf32>
    %cst_21 = arith.constant dense<0xFF800000> : vector<16xf32>
    %61 = vector.multi_reduction <maximumf>, %60, %cst_21 [1] : vector<16x16xf32> to vector<16xf32>
    %62 = vector.shape_cast %61 : vector<16xf32> to vector<16x1xf32>
    %63 = vector.broadcast %62 : vector<16x1xf32> to vector<16x16xf32>
    %64 = arith.subf %60, %63 : vector<16x16xf32>
    %65 = math.exp %64 : vector<16x16xf32>
    %cst_22 = arith.constant dense<0.000000e+00> : vector<16xf32>
    %66 = vector.multi_reduction <add>, %65, %cst_22 [1] : vector<16x16xf32> to vector<16xf32>
    %67 = vector.shape_cast %66 : vector<16xf32> to vector<16x1xf32>
    %68 = tpu.reciprocal %67 {approx = true} : vector<16x1xf32> -> vector<16x1xf32>
    %69 = vector.broadcast %68 : vector<16x1xf32> to vector<16x16xf32>
    %70 = arith.mulf %65, %69 : vector<16x16xf32>
    %cst_23 = arith.constant dense<0.000000e+00> : vector<16x8xf32>
    %71 = tpu.matmul %70, %59, %cst_23 {dimension_numbers = #tpu.dot_dimension_numbers<[1], [0], [0], [1], [0, 0, 1, 1], [], []>} : vector<16x16xf32>, vector<16x8xf32>, vector<16x8xf32> -> vector<16x8xf32>
    %72 = tpu.concatenate %20, %37, %54, %71 in 1 : vector<16x8xf32>, vector<16x8xf32>, vector<16x8xf32>, vector<16x8xf32> -> vector<16x32xf32>
    %c0_24 = arith.constant 0 : index
    %c0_25 = arith.constant 0 : index
    %73 = vector.load %arg3[%c0_24, %c0_25] : memref<32x32xf32, #tpu.memory_space<vmem>>, vector<32x32xf32>
    %cst_26 = arith.constant dense<0.000000e+00> : vector<16x32xf32>
    %74 = tpu.matmul %72, %73, %cst_26 {dimension_numbers = #tpu.dot_dimension_numbers<[1], [0], [0], [1], [0, 0, 1, 1], [], []>} : vector<16x32xf32>, vector<32x32xf32>, vector<16x32xf32> -> vector<16x32xf32>
    %c0_27 = arith.constant 0 : index
    %c0_28 = arith.constant 0 : index
    %75 = vector.load %arg4[%c0_27, %c0_28] : memref<1x32xf32, #tpu.memory_space<vmem>>, vector<1x32xf32>
    %76 = vector.broadcast %75 : vector<1x32xf32> to vector<16x32xf32>
    %77 = arith.addf %74, %76 : vector<16x32xf32>
    %c0_29 = arith.constant 0 : index
    %c0_30 = arith.constant 0 : index
    %c0_31 = arith.constant 0 : index
    %78 = vector.load %arg5[%c0_29, %c0_30, %c0_31] : memref<1x16x32xf32, #tpu.memory_space<vmem>>, vector<1x16x32xf32>
    %79 = vector.shape_cast %78 : vector<1x16x32xf32> to vector<16x32xf32>
    %80 = vector.shape_cast %77 : vector<16x32xf32> to vector<1x16x32xf32>
    tpu.vector_store %arg5[%c0_29, %c0_30, %c0_31], %80 {strides = array<i32>} : memref<1x16x32xf32, #tpu.memory_space<vmem>>, vector<1x16x32xf32>,
    return
  }
  func.func @transform_0(%arg0: i32) -> (i32, i32, i32) {
    %c0_i32 = arith.constant 0 : i32
    %c0_i32_0 = arith.constant 0 : i32
    %c0_i32_1 = arith.constant 0 : i32
    return %arg0, %c0_i32, %c0_i32_0 : i32, i32, i32
  }
  func.func @transform_1(%arg0: i32) -> (i32, i32) {
    %c0_i32 = arith.constant 0 : i32
    %c0_i32_0 = arith.constant 0 : i32
    %c0_i32_1 = arith.constant 0 : i32
    return %c0_i32, %c0_i32_0 : i32, i32
  }
  func.func @transform_2(%arg0: i32) -> (i32, i32) {
    %c0_i32 = arith.constant 0 : i32
    %c0_i32_0 = arith.constant 0 : i32
    %c0_i32_1 = arith.constant 0 : i32
    return %c0_i32, %c0_i32_0 : i32, i32
  }
  func.func @transform_3(%arg0: i32) -> (i32, i32) {
    %c0_i32 = arith.constant 0 : i32
    %c0_i32_0 = arith.constant 0 : i32
    %c0_i32_1 = arith.constant 0 : i32
    return %c0_i32, %c0_i32_0 : i32, i32
  }
  func.func @transform_4(%arg0: i32) -> (i32, i32, i32) {
    %c0_i32 = arith.constant 0 : i32
    %c0_i32_0 = arith.constant 0 : i32
    %c0_i32_1 = arith.constant 0 : i32
    return %arg0, %c0_i32, %c0_i32_0 : i32, i32, i32
  }
}

</mosaic_0001>

<bundles_post_ra>
// kernel: tpu_custom_call.1
= control target key start
LH: loop header
LB: loop body
LE: loop exit
PB: predicated region body
PF: predicated region fallthrough
CT: control target
= control target key end

     0   :  { %9 = vsyncpa [#allocation3], 0  ;;  %s2162_s0 = inlined_call_operand.hbm [shape: f32[2,16,32], index: 0, kind: input, shape index: {}]   ;;  %s2163_s1 = inlined_call_operand.hbm [shape: f32[32,96], index: 1, kind: input, shape index: {}]   ;;  %s2164_s2 = inlined_call_operand.hbm [shape: f32[32,32], index: 2, kind: input, shape index: {}]   ;;  %s2165_s3 = inlined_call_operand.vmem [shape: f32[1,32], index: 3, kind: input, shape index: {}]   ;;  %s2166_s4 = inlined_call_operand.hbm [shape: f32[2,16,32], index: 4, kind: output, shape index: {}]  }
   0x1   :  { %11 = vsyncpa [#allocation3 + $0x1], 0 }
   0x2   :  { %12 = vsyncpa [#allocation6], 0 }
   0x3   :  { %13 = vsyncpa [#allocation4], 0 }
   0x4   :  { %15 = vsyncpa [#allocation4 + $0x1], 0  ;;  %s1851_s15 = smov 0   ;;  %s1853_s16 = smov 0  }
   0x5   :  { %s1855_s17 = smov 0   ;;  %s1857_s18 = smov 0  }
   0x6 LB: > { %s1872_s19 = sadd.s32 4294967295, %s1803_s18   ;;  %s1368_s20 = sadd.s32 4294967294, %s1803_s18   ;;  %s1803_s18 = sphi %s1857_s18, %s2187_s18   ;;  %s1799_s17 = sphi %s1855_s17, %s2186_s17   ;;  %s1795_s16 = sphi %s1853_s16, %s2185_s16   ;;  %s1791_s15 = sphi %s1851_s15, %s2184_s15  }
   0x7   : > { %p41_p0 = scmp.ne.s32.totalorder %s1795_s16, %s1791_s15  ;;  %p2167_p1 = scmp.eq.s32.totalorder %s1872_s19, 0 }
   0x8   : > { %p128_p2 = scmp.eq.s32.totalorder %s1872_s19, 1  ;;  %p134_p3 = scmp.eq.s32.totalorder %s1368_s20, 1 }
   0x9   : > { %p1881_p4 = por %p2167_p1, %p41_p0  ;;  %p1369_p5 = scmp.ge.s32.totalorder %s1803_s18, 1 }
   0xa   : > { %p1886_p6 = por %p134_p3, %p41_p0  ;;  %p141_p7 = scmp.lt.s32.totalorder %s1803_s18, 3 }
   0xb   : > { %s2171_s21 = scalar_select %p1881_p4, 1, 0 }
   0xc   : > { %s2172_s22 = scalar_select %p1886_p6, 1, 0 }
   0xd   : > { %p1891_p8 = pnand %p1369_p5, %p141_p7  ;;  %s1805_s24 = smov [#allocation5]  }
   0xe   : > { %s153_s25 = sshll.u32 %s1805_s24, 4  ;;  %s1806_s27 = smov [#allocation7]   ;;  %s154_s25 = int_to_ptr.vmem [resolvable:$true] %s153_s25 }
   0xf   : > { %s2173_s23 = scalar_select %p1891_p8, 1, 0 }
  0x10   : > { %p1551_p9 = pneg %p1891_p8  ;;  %s166_s28 = sshll.u32 %s1806_s27, 4  ;;  %s167_s28 = int_to_ptr.vmem [resolvable:$true] %s166_s28 }
  0x11   : > { %s1666_s29 = scalar_lea.vmem %s154_s25, 512  ;;  %p1674_p5 = scmp.lt.s32.totalorder %s154_s25, %s154_s25 }
  0x12   : > { %p1900_p11 = pnand %p1551_p9, %p2167_p1  ;;  %p1667_p13 = scmp.ne.s32.totalorder %s154_s25, %s1666_s29 }
  0x13   : > { %p1675_p7 = scmp.lt.s32.totalorder %s1666_s29, %s1666_s29 }
  0x14   : > { %p1657_p12 = pneg %p1900_p11 }
  0x15   : > { %p1676_p10 = por %p1675_p7, %p1674_p5 }
  0x16   : > { %p1669_p0 = pnand %p1667_p13, %p1657_p12 }
  0x18   : > { %p1670_p3 = pneg %p1669_p0 }
  0x1a   : > { %p1677_p9 = pnand %p1676_p10, %p1670_p3 }
  0x1c   : > { %1680 = shalt.err (!%p1677_p9)
}
  0x1d   : > { %s1807_s30 = smov 128   ;;  %s1808_s5 = smov 8  }
  0x1e   : > { %1554 = dma.hbm_to_vmem [thread:$0]  (!%p1900_p11), %s2163_s1, 512, %s154_s25, [#allocation6], %s1807_s30, %s1807_s30, %s1808_s5  }
  0x1f   : > { %s1692_s8 = scalar_lea.vmem %s167_s28, 512  ;;  %p1700_p10 = scmp.lt.s32.totalorder %s167_s28, %s167_s28 }
  0x20   : > { %p1693_p13 = scmp.ne.s32.totalorder %s167_s28, %s1692_s8  ;;  %p1701_p3 = scmp.lt.s32.totalorder %s1692_s8, %s1692_s8 }
  0x22   : > { %p1695_p0 = pnand %p1693_p13, %p1657_p12  ;;  %p1702_p7 = por %p1701_p3, %p1700_p10 }
  0x24   : > { %p1696_p5 = pneg %p1695_p0 }
  0x26   : > { %p1703_p9 = pnand %p1702_p7, %p1696_p5 }
  0x28   : > { %1706 = shalt.err (!%p1703_p9)
}
  0x29   : > { %1557 = dma.hbm_to_vmem [thread:$0]  (!%p1900_p11), %s2164_s2, 512, %s167_s28, [#allocation6], %s1807_s30, %s1807_s30, %s1808_s5  }
  0x2a   : > { %s1929_s11 = sadd.s32 1, %s1803_s18   ;;  %s28_s12 = sadd.s32 1, %s1799_s17 }
  0x2b   : > { %s25_s13 = ssub.s32 %s1803_s18, %s1929_s11  ;;  %p35_p12 = scmp.ne.s32.totalorder %s1799_s17, %s1795_s16 }
  0x2c   : > { %p26_p13 = scmp.eq.s32.totalorder %s25_s13, 0  ;;  %p36_p0 = scmp.eq.s32.totalorder %s1803_s18, 0 }
  0x2d   : > { %p1939_p5 = por %p128_p2, %p35_p12  ;;  %p1568_p10 = scmp.lt.s32.totalorder %s1803_s18, 2 }
  0x2e   : > { %s1945_s20 = scalar_select %p26_p13, %s1799_s17, %s28_s12  }
  0x2f   : > { %s2175_s14 = scalar_select %p1939_p5, 1, 0 }
  0x30   : > { %p37_p3 = por %p36_p0, %p35_p12  ;;  %s183_s24 = sand.u32 1, %s1799_s17  }
  0x31   : > { %s1373_s25 = sshll.u32 %s183_s24, 4  ;;  %s1415_s26 = sshll.u32 %s1803_s18, 8 }
  0x32   : > { %s1952_s29 = scalar_lea.hbm %s2162_s0, %s1415_s26  ;;  %s187_s6 = scalar_lea.vmem [#allocation2], %s1373_s25 }
  0x33   : > { %s194_s7 = sshll.u32 %s187_s6, 4  ;;  %p1956_p2 = pnand %p1568_p10, %p37_p3  ;;  %s1954_s7 = int_to_ptr.vmem [resolvable:$true] %s194_s7 }
  0x34   : > { %s1960_s9 = scalar_lea.sflag [#allocation3], %s183_s24  ;;  %s1707_s10 = scalar_lea.hbm %s1952_s29, 256 }
  0x35   : > { %p1708_p11 = scmp.ne.s32.totalorder %s1952_s29, %s1707_s10  ;;  %p1709_p7 = pneg %p1956_p2 }
  0x36   : > { %s1712_s25 = scalar_lea.hbm %s2162_s0, 512  ;;  %p1713_p13 = scmp.lt.s32.totalorder %s1952_s29, %s2162_s0 }
  0x37   : > { %p1710_p9 = pnand %p1709_p7, %p1708_p11  ;;  %p1714_p0 = scmp.lt.s32.totalorder %s1712_s25, %s1707_s10 }
  0x39   : > { %p1711_p12 = pneg %p1710_p9  ;;  %p1715_p10 = por %p1714_p0, %p1713_p13 }
  0x3b   : > { %p1716_p3 = pnand %p1715_p10, %p1711_p12 }
  0x3d   : > { %1719 = shalt.err (!%p1716_p3)
}
  0x3e   : > { %s1720_s24 = scalar_lea.vmem %s1954_s7, 256  ;;  %s1809_s28 = smov [#allocation2]  }
  0x3f   : > { %p1721_p1 = scmp.ne.s32.totalorder %s1954_s7, %s1720_s24  ;;  %s1725_s6 = sshll.u32 %s1809_s28, 4  ;;  %s1726_s6 = int_to_ptr.vmem [resolvable:$false] %s1725_s6 }
  0x40   : > { %s1727_s12 = scalar_lea.vmem %s1726_s6, 512  ;;  %p1728_p9 = scmp.lt.s32.totalorder %s1954_s7, %s1726_s6 }
  0x41   : > { %p1723_p6 = pnand %p1721_p1, %p1709_p7  ;;  %p1729_p5 = scmp.lt.s32.totalorder %s1727_s12, %s1720_s24 }
  0x43   : > { %p1724_p11 = pneg %p1723_p6  ;;  %p1730_p4 = por %p1729_p5, %p1728_p9 }
  0x45   : > { %p1731_p8 = pnand %p1730_p4, %p1724_p11 }
  0x47   : > { %1734 = shalt.err (!%p1731_p8)
}
  0x48   : > { %1561 = dma.hbm_to_vmem [thread:$0]  (!%p1956_p2), %s1952_s29, 256, %s1954_s7, %s1960_s9, %s1807_s30, %s1807_s30, %s1808_s5  }
  0x49   : > { %p2177_p1 = scmp.ne.s32.totalorder %s2173_s23, 0 }
  0x4a   : > { %s1987_s10 = sand.u32 (!%p2177_p1), 1, %s1795_s16   ;;  %p2178_p4 = scmp.ne.s32.totalorder (!%p2177_p1), %s2171_s21, 0 }
  0x4b   : > { %206 = sbr.rel (%p2177_p1) target bundleno = 2997 (0xbb5), region = 36  ;;  %s1377_s13 = sshll.u32 (!%p2177_p1), %s1987_s10, 4 }
  0x4c   : > { %s209_s25 = scalar_lea.sflag (!%p2177_p1), [#allocation3], %s1987_s10  ;;  %s212_s8 = scalar_lea.vmem (!%p2177_p1), [#allocation2], %s1377_s13 }
  0x50   : > { %1778 = dma.done.wait (%p2178_p4), %s209_s25, 256  }
  0x51   : > { %1780 = vsyncadd (%p2178_p4), %s209_s25, 4294967040  ;;  %p2179_p6 = scmp.eq.s32.totalorder %s1872_s19, 0 }
  0x53   : > { %1782 = dma.done.wait (%p2179_p6), [#allocation6], 1024   ;;  %p2180_p8 = pmov %p2179_p6 }
  0x54   : > { %vm251_vm0 = vcmask 261120   ;;  %v250_v0 = vld [vmem:[#allocation5 + $0x18] sm:$0xff]  ;;  %v249_v1 = vld [vmem:[#allocation5 + $0x10] sm:$0xff]  ;;  %v248_v3 = vld [vmem:[#allocation5 + $0x8] sm:$0xff]  ;;  %s1810_s21 = smov 96   ;;  %vm341_vm1 = vcmask 64512  }
  0x55   : > { %1784 = vsyncadd (%p2180_p8), [#allocation6], 4294966272  ;;  %1461 = vmatprep.subr.mxu0 %v250_v0  ;;  %v245_v2 = vld [vmem:[%s212_s8] sm:$0xff]  ;;  %v246_v5 = vld [vmem:[%s212_s8 + $0x8] sm:$0xff]  ;;  %vm427_vm2 = vcmask 130048   ;;  %s1811_s23 = smov 64  }
  0x56   : > { %1462 = vmatpush3.msra.mxu0 %v250_v0  ;;  %1469 = vmatprep.mubr.msk.f32.mxu0 %vm251_vm0, %v245_v2  ;;  %v247_v4 = vld [vmem:[#allocation5] sm:$0xff]  ;;  %s1812_s30 = smov 120   ;;  %s1813_s5 = smov 88   ;;  %vm1165_vm3 = vcmask 195584  }
  0x57   : > { %1463 = vmatprep.subr.mxu0 %v249_v1  ;;  %s1814_s29 = smov 56   ;;  %s1815_s7 = smov 80  }
  0x58   : > { %1464 = vmatpush3.msra.mxu0 %v249_v1  ;;  %s1816_s9 = smov 112   ;;  %s1817_s26 = smov 48  }
  0x59   : > { %1465 = vmatprep.subr.mxu0 %v248_v3  ;;  %s1818_s27 = smov 72   ;;  %s1819_s24 = smov 104  }
  0x5a   : > { %1466 = vmatpush3.msra.mxu0 %v248_v3  ;;  %s1820_s28 = smov 40   ;;  %s1821_s6 = smov 8  }
  0x5b   : > { %1467 = vmatprep.subr.mxu0 %v247_v4  ;;  %s1822_s12 = smov 16   ;;  %s1823_s25 = smov 24  }
  0x5c   : > { %1468 = vmatpush3.msra.mxu0 %v247_v4  ;;  %p2181_p2 = scmp.ne.s32.totalorder %s2175_s14, 0 }
  0x5d   : > { %1470 = vmatmul.mubr.msk.f32.vlgmr.msra.gmra.mxu0 %vm251_vm0, %v246_v5 }
 0x11d   : > { %v2003_v6 = vpop.f32.mrf.mxu0 }
 0x11e   : > { %339 = vrot.lane.b32.xlu0 %v2003_v6, %s1810_s21  ;;  %v2019_v11 = vmul.f32 0.35355338, %v2003_v6 }
 0x11f   : > { %v2006_v7 = vpop.f32.mrf.mxu0 }
 0x120   : > { %v2009_v8 = vmul.f32 0.35355338, %v2006_v7 }
 0x122   : > { %337 = vrot.lane.b32.xlu0 %v2006_v7, %s1810_s21  ;;  %1476 = vmatprep.mubr.msk.f32.mxu1 %vm341_vm1, %v2009_v8 }
 0x190   : > { %v340_v9 = vpop.permute.xlu0 %339 }
 0x191   : > { %1472 = vmatprep.subr.msk.mxu1 %vm341_vm1, %v340_v9 }
 0x192   : > { %1473 = vmatpush3.xpose.msk.msra.mxu1 %vm341_vm1, %v340_v9 }
 0x194   : > { %v338_v10 = vpop.permute.xlu0 %337 }
 0x195   : > { %1474 = vmatprep.subr.msk.mxu1 %vm341_vm1, %v338_v10 }
 0x196   : > { %1475 = vmatpush3.xpose.msk.msra.mxu1 %vm341_vm1, %v338_v10 }
 0x199   : > { %1477 = vmatmul.mubr.msk.f32.vlgmr.msra.gmra.mxu1 %vm341_vm1, %v2019_v11 }
 0x259   : > { %v1478_v12 = vpop.f32.mrf.mxu1 }
 0x25a   : > { %v431_v15 = vsel %vm427_vm2, %v1478_v12, -inf }
 0x25b   : > { %v418_v13 = vpop.f32.mrf.mxu1 }
 0x25c   : > { %v428_v14 = vsel %vm427_vm2, %v418_v13, -inf }
 0x25d   : > { %429 = vmax.xlane.f32.xlu1 %v428_v14 }
 0x261   : > { %432 = vmax.xlane.f32.xlu1 %v431_v15 }
 0x2e6   : > { %v430_v16 = vpop.xlane.xlu1 %429 }
 0x2e7   : > { %v434_v17 = vsub.f32 %v418_v13, %v430_v16 }
 0x2e9   : > { %v436_v18 = vmul.f32 1.442695, %v434_v17 }
 0x2ea   : > { %v433_v19 = vpop.xlane.xlu1 %432 }
 0x2eb   : > { %1623 = vpow2.f32 %v436_v18  ;;  %v435_v20 = vsub.f32 %v1478_v12, %v433_v19 }
 0x2ed   : > { %v438_v21 = vmul.f32 1.442695, %v435_v20 }
 0x2ef   : > { %1625 = vpow2.f32 %v438_v21 }
 0x2f8   : > { %v1624_v22 = vpop.eup %1623 }
 0x2f9   : > { %v440_v23 = vsel %vm427_vm2, %v1624_v22, 0.0 }
 0x2fa   : > { %441 = vadd.xlane.f32.xlu0 %v440_v23 }
 0x2fc   : > { %v1626_v24 = vpop.eup %1625 }
 0x2fd   : > { %v443_v25 = vsel %vm427_vm2, %v1626_v24, 0.0 }
 0x2fe   : > { %444 = vadd.xlane.f32.xlu1 %v443_v25 }
 0x30f   : > { %452 = vrot.lane.b32.xlu1 %v2003_v6, %s1811_s23 }
 0x310   : > { %537 = vrot.lane.b32.xlu0 %v2009_v8, %s1812_s30 }
 0x313   : > { %450 = vrot.lane.b32.xlu1 %v2006_v7, %s1811_s23  ;;  %s244_s23 = scalar_lea.vmem [#allocation8], %s1377_s13  ;;  %s1263_s13 = scalar_lea.sflag [#allocation4], %s1987_s10 }
 0x317   : > { %543 = vrot.lane.b32.xlu1 %v2003_v6, %s1813_s5 }
 0x31b   : > { %541 = vrot.lane.b32.xlu1 %v2006_v7, %s1813_s5  ;;  %s1416_s5 = sshll.u32 %s1872_s19, 8  ;;  %s1824_s19 = smov [#allocation8]  }
 0x31f   : > { %539 = vrot.lane.b32.xlu1 %v2019_v11, %s1812_s30  ;;  %s1276_s30 = sshll.u32 %s244_s23, 4  ;;  %s2111_s30 = int_to_ptr.vmem [resolvable:$true] %s1276_s30 }
 0x383   : > { %v442_v26 = vpop.xlane.xlu0 %441 }
 0x384   : > { %1627 = vrcp.f32 %v442_v26 }
 0x387   : > { %v445_v27 = vpop.xlane.xlu1 %444  ;;  %v538_v36 = vpop.permute.xlu0 %537 }
 0x388   : > { %1629 = vrcp.f32 %v445_v27 }
 0x38b   : > { %v453_v28 = vpop.permute.xlu1 %452 }
 0x38c   : > { %1479 = vmatprep.subr.mxu1 %v453_v28 }
 0x38d   : > { %1480 = vmatpush3.msra.mxu1 %v453_v28 }
 0x38f   : > { %v451_v29 = vpop.permute.xlu1 %450 }
 0x390   : > { %1481 = vmatprep.subr.mxu1 %v451_v29 }
 0x391   : > { %v1628_v30 = vpop.eup %1627  ;;  %1482 = vmatpush3.msra.mxu1 %v451_v29 }
 0x392   : > { %v448_v31 = vmul.f32 %v1628_v30, %v1624_v22 }
 0x393   : > { %v544_v32 = vpop.permute.xlu1 %543 }
 0x394   : > { %1483 = vmatprep.mubr.msk.f32.mxu1 %vm427_vm2, %v448_v31  ;;  %1486 = vmatprep.subr.msk.mxu1 %vm341_vm1, %v544_v32 }
 0x395   : > { %v1630_v33 = vpop.eup %1629 }
 0x396   : > { %v449_v34 = vmul.f32 %v1630_v33, %v1626_v24 }
 0x397   : > { %v542_v35 = vpop.permute.xlu1 %541 }
 0x398   : > { %1484 = vmatmul.mubr.msk.f32.vlgmr.msra.gmra.mxu1 %vm427_vm2, %v449_v34 }
 0x399   : > { %1487 = vmatpush3.xpose.msk.msra.mxu1 %vm341_vm1, %v544_v32  ;;  %1490 = vmatprep.mubr.msk.f32.mxu1 %vm341_vm1, %v538_v36 }
 0x39a   : > { %1488 = vmatprep.subr.msk.mxu1 %vm341_vm1, %v542_v35 }
 0x39b   : > { %v540_v37 = vpop.permute.xlu1 %539 }
 0x39d   : > { %1489 = vmatpush3.xpose.msk.msra.mxu1 %vm341_vm1, %v542_v35 }
 0x3a0   : > { %1491 = vmatmul.mubr.msk.f32.vlgmr.msra.gmra.mxu1 %vm341_vm1, %v540_v37 }
 0x458   : > { %v2041_v38 = vpop.f32.mrf.mxu1 }
 0x45a   : > { %v2043_v39 = vpop.f32.mrf.mxu1 }
 0x460   : > { %v1492_v40 = vpop.f32.mrf.mxu1 }
 0x461   : > { %v631_v41 = vsel %vm427_vm2, %v1492_v40, -inf }
 0x462   : > { %632 = vmax.xlane.f32.xlu0 %v631_v41  ;;  %v619_v42 = vpop.f32.mrf.mxu1 }
 0x463   : > { %v628_v43 = vsel %vm427_vm2, %v619_v42, -inf }
 0x464   : > { %629 = vmax.xlane.f32.xlu1 %v628_v43 }
 0x475   : > { %652 = vrot.lane.b32.xlu1 %v2003_v6, %s1814_s29 }
 0x478   : > { %650 = vrot.lane.b32.xlu0 %v2006_v7, %s1814_s29 }
 0x479   : > { %743 = vrot.lane.b32.xlu1 %v2003_v6, %s1815_s7 }
 0x47c   : > { %737 = vrot.lane.b32.xlu0 %v2009_v8, %s1816_s9 }
 0x47d   : > { %741 = vrot.lane.b32.xlu1 %v2006_v7, %s1815_s7 }
 0x4eb   : > { %v633_v44 = vpop.xlane.xlu0 %632 }
 0x4ec   : > { %v635_v45 = vsub.f32 %v1492_v40, %v633_v44 }
 0x4ed   : > { %v630_v46 = vpop.xlane.xlu1 %629 }
 0x4ee   : > { %v638_v47 = vmul.f32 1.442695, %v635_v45  ;;  %v634_v48 = vsub.f32 %v619_v42, %v630_v46 }
 0x4ef   : > { %v651_v51 = vpop.permute.xlu0 %650 }
 0x4f0   : > { %1631 = vpow2.f32 %v638_v47  ;;  %v636_v49 = vmul.f32 1.442695, %v634_v48 }
 0x4f1   : > { %v653_v50 = vpop.permute.xlu1 %652 }
 0x4f2   : > { %1633 = vpow2.f32 %v636_v49  ;;  %1493 = vmatprep.subr.mxu0 %v653_v50 }
 0x4f3   : > { %1494 = vmatpush3.msra.mxu0 %v653_v50  ;;  %v738_v0 = vpop.permute.xlu0 %737 }
 0x4f4   : > { %1495 = vmatprep.subr.mxu0 %v651_v51 }
 0x4f5   : > { %1496 = vmatpush3.msra.mxu0 %v651_v51  ;;  %v744_v52 = vpop.permute.xlu1 %743 }
 0x4f6   : > { %1500 = vmatprep.subr.msk.mxu0 %vm341_vm1, %v744_v52 }
 0x4f9   : > { %v742_v57 = vpop.permute.xlu1 %741 }
 0x4fd   : > { %v1632_v53 = vpop.eup %1631 }
 0x4fe   : > { %v643_v54 = vsel %vm427_vm2, %v1632_v53, 0.0 }
 0x4ff   : > { %v1634_v55 = vpop.eup %1633  ;;  %644 = vadd.xlane.f32.xlu1 %v643_v54 }
 0x500   : > { %v640_v56 = vsel %vm427_vm2, %v1634_v55, 0.0 }
 0x503   : > { %641 = vadd.xlane.f32.xlu1 %v640_v56 }
 0x514   : > { %739 = vrot.lane.b32.xlu1 %v2019_v11, %s1816_s9  ;;  %s2117_s9 = scalar_lea.hbm %s2166_s4, %s1416_s5 }
 0x588   : > { %v645_v58 = vpop.xlane.xlu1 %644 }
 0x589   : > { %1635 = vrcp.f32 %v645_v58  ;;  %v1170_v58 = vld [vmem:[#allocation7 + $0x10] sm:$0xff] }
 0x58c   : > { %v642_v59 = vpop.xlane.xlu1 %641 }
 0x58d   : > { %1637 = vrcp.f32 %v642_v59  ;;  %v1168_v59 = vld [vmem:[#allocation7] sm:$0xff] }
 0x590   : > { %v740_v1 = vpop.permute.xlu1 %739 }
 0x596   : > { %v1636_v60 = vpop.eup %1635 }
 0x597   : > { %v649_v63 = vmul.f32 %v1636_v60, %v1632_v53 }
 0x59a   : > { %v1638_v61 = vpop.eup %1637 }
 0x59b   : > { %v648_v62 = vmul.f32 %v1638_v61, %v1634_v55 }
 0x59d   : > { %1497 = vmatprep.mubr.msk.f32.mxu0 %vm427_vm2, %v648_v62 }
 0x59e   : > { %1498 = vmatmul.mubr.msk.f32.vlgmr.msra.gmra.mxu0 %vm427_vm2, %v649_v63 }
 0x59f   : > { %1501 = vmatpush3.xpose.msk.msra.mxu0 %vm341_vm1, %v744_v52  ;;  %1504 = vmatprep.mubr.msk.f32.mxu0 %vm341_vm1, %v738_v0 }
 0x5a0   : > { %1502 = vmatprep.subr.msk.mxu0 %vm341_vm1, %v742_v57 }
 0x5a3   : > { %1503 = vmatpush3.xpose.msk.msra.mxu0 %vm341_vm1, %v742_v57  ;;  %v1171_v57 = vld [vmem:[#allocation7 + $0x18] sm:$0xff] }
 0x5a6   : > { %1505 = vmatmul.mubr.msk.f32.vlgmr.msra.gmra.mxu0 %vm341_vm1, %v740_v1 }
 0x65e   : > { %v2063_v2 = vpop.f32.mrf.mxu0 }
 0x660   : > { %v2065_v3 = vpop.f32.mrf.mxu0 }
 0x666   : > { %v1506_v4 = vpop.f32.mrf.mxu0 }
 0x667   : > { %v831_v5 = vsel %vm427_vm2, %v1506_v4, -inf }
 0x668   : > { %832 = vmax.xlane.f32.xlu1 %v831_v5  ;;  %v819_v9 = vpop.f32.mrf.mxu0 }
 0x669   : > { %v828_v10 = vsel %vm427_vm2, %v819_v9, -inf }
 0x66a   : > { %829 = vmax.xlane.f32.xlu0 %v828_v10 }
 0x679   : > { %852 = vrot.lane.b32.xlu1 %v2003_v6, %s1817_s26 }
 0x67d   : > { %943 = vrot.lane.b32.xlu1 %v2003_v6, %s1818_s27 }
 0x681   : > { %941 = vrot.lane.b32.xlu1 %v2006_v7, %s1818_s27  ;;  %s1739_s27 = sshll.u32 %s1824_s19, 4  ;;  %s1740_s27 = int_to_ptr.vmem [resolvable:$false] %s1739_s27 }
 0x682   : > { %p1742_p13 = scmp.lt.s32.totalorder %s2111_s30, %s1740_s27 }
 0x685   : > { %939 = vrot.lane.b32.xlu1 %v2019_v11, %s1819_s24 }
 0x6f1   : > { %v833_v12 = vpop.xlane.xlu1 %832 }
 0x6f2   : > { %v835_v13 = vsub.f32 %v1506_v4, %v833_v12 }
 0x6f3   : > { %v830_v14 = vpop.xlane.xlu0 %829 }
 0x6f4   : > { %v838_v15 = vmul.f32 1.442695, %v835_v13  ;;  %v834_v16 = vsub.f32 %v819_v9, %v830_v14 }
 0x6f5   : > { %v853_v17 = vpop.permute.xlu1 %852 }
 0x6f6   : > { %1639 = vpow2.f32 %v838_v15  ;;  %v836_v18 = vmul.f32 1.442695, %v834_v16  ;;  %1507 = vmatprep.subr.mxu1 %v853_v17 }
 0x6f7   : > { %1508 = vmatpush3.msra.mxu1 %v853_v17 }
 0x6f8   : > { %1641 = vpow2.f32 %v836_v18 }
 0x6f9   : > { %v944_v25 = vpop.permute.xlu1 %943 }
 0x703   : > { %v1640_v19 = vpop.eup %1639 }
 0x704   : > { %v843_v20 = vsel %vm427_vm2, %v1640_v19, 0.0 }
 0x705   : > { %v1642_v21 = vpop.eup %1641  ;;  %844 = vadd.xlane.f32.xlu0 %v843_v20 }
 0x706   : > { %v840_v22 = vsel %vm427_vm2, %v1642_v21, 0.0 }
 0x709   : > { %841 = vadd.xlane.f32.xlu0 %v840_v22 }
 0x71f   : > { %850 = vrot.lane.b32.xlu0 %v2006_v7, %s1817_s26  ;;  %s1735_s26 = scalar_lea.vmem %s2111_s30, 256 }
 0x720   : > { %p1736_p5 = scmp.ne.s32.totalorder %s2111_s30, %s1735_s26 }
 0x722   : > { %p1737_p7 = pnand %p1736_p5, %p2181_p2 }
 0x723   : > { %937 = vrot.lane.b32.xlu0 %v2009_v8, %s1819_s24  ;;  %v942_v8 = vpop.permute.xlu1 %941  ;;  %s1741_s24 = scalar_lea.vmem %s1740_s27, 512 }
 0x724   : > { %p1738_p12 = pneg %p1737_p7  ;;  %p1743_p0 = scmp.lt.s32.totalorder %s1741_s24, %s1735_s26 }
 0x726   : > { %p1744_p10 = por %p1743_p0, %p1742_p13 }
 0x727   : > { %v940_v31 = vpop.permute.xlu1 %939 }
 0x728   : > { %p1745_p3 = pnand %p1744_p10, %p1738_p12 }
 0x78e   : > { %v845_v11 = vpop.xlane.xlu0 %844 }
 0x78f   : > { %1643 = vrcp.f32 %v845_v11 }
 0x792   : > { %v842_v23 = vpop.xlane.xlu0 %841 }
 0x793   : > { %1645 = vrcp.f32 %v842_v23 }
 0x796   : > { %v851_v24 = vpop.permute.xlu0 %850 }
 0x797   : > { %1509 = vmatprep.subr.mxu1 %v851_v24 }
 0x798   : > { %1510 = vmatpush3.msra.mxu1 %v851_v24 }
 0x799   : > { %1514 = vmatprep.subr.msk.mxu1 %vm341_vm1, %v944_v25 }
 0x79a   : > { %v938_v30 = vpop.permute.xlu0 %937 }
 0x79c   : > { %v1644_v26 = vpop.eup %1643 }
 0x79d   : > { %v849_v29 = vmul.f32 %v1644_v26, %v1640_v19 }
 0x7a0   : > { %v1646_v27 = vpop.eup %1645 }
 0x7a1   : > { %v848_v28 = vmul.f32 %v1646_v27, %v1642_v21 }
 0x7a3   : > { %1511 = vmatprep.mubr.msk.f32.mxu1 %vm427_vm2, %v848_v28 }
 0x7a4   : > { %1512 = vmatmul.mubr.msk.f32.vlgmr.msra.gmra.mxu1 %vm427_vm2, %v849_v29 }
 0x7a5   : > { %1515 = vmatpush3.xpose.msk.msra.mxu1 %vm341_vm1, %v944_v25  ;;  %1518 = vmatprep.mubr.msk.f32.mxu1 %vm341_vm1, %v938_v30 }
 0x7a6   : > { %1516 = vmatprep.subr.msk.mxu1 %vm341_vm1, %v942_v8 }
 0x7a9   : > { %1517 = vmatpush3.xpose.msk.msra.mxu1 %vm341_vm1, %v942_v8 }
 0x7ac   : > { %1519 = vmatmul.mubr.msk.f32.vlgmr.msra.gmra.mxu1 %vm341_vm1, %v940_v31 }
 0x864   : > { %v1513_v32 = vpop.f32.mrf.mxu1 }
 0x866   : > { %v928_v33 = vpop.f32.mrf.mxu1 }
 0x86c   : > { %v1520_v34 = vpop.f32.mrf.mxu1 }
 0x86d   : > { %v1031_v35 = vsel %vm427_vm2, %v1520_v34, -inf }
 0x86e   : > { %1032 = vmax.xlane.f32.xlu1 %v1031_v35  ;;  %v1019_v36 = vpop.f32.mrf.mxu1 }
 0x86f   : > { %v1028_v37 = vsel %vm427_vm2, %v1019_v36, -inf }
 0x870   : > { %1029 = vmax.xlane.f32.xlu0 %v1028_v37 }
 0x87f   : > { %1052 = vrot.lane.b32.xlu1 %v2003_v6, %s1820_s28 }
 0x883   : > { %1139 = vrot.lane.b32.xlu1 %v2065_v3, %s1821_s6 }
 0x887   : > { %1141 = vrot.lane.b32.xlu1 %v2063_v2, %s1821_s6 }
 0x88b   : > { %1149 = vrot.lane.b32.xlu1 %v1513_v32, %s1822_s12 }
 0x8f7   : > { %v1033_v40 = vpop.xlane.xlu1 %1032 }
 0x8f8   : > { %v1035_v41 = vsub.f32 %v1520_v34, %v1033_v40 }
 0x8f9   : > { %v1030_v42 = vpop.xlane.xlu0 %1029 }
 0x8fa   : > { %v1038_v43 = vmul.f32 1.442695, %v1035_v41  ;;  %v1034_v44 = vsub.f32 %v1019_v36, %v1030_v42 }
 0x8fb   : > { %v1053_v45 = vpop.permute.xlu1 %1052 }
 0x8fc   : > { %1647 = vpow2.f32 %v1038_v43  ;;  %v1036_v46 = vmul.f32 1.442695, %v1034_v44  ;;  %1521 = vmatprep.subr.mxu0 %v1053_v45 }
 0x8fd   : > { %1522 = vmatpush3.msra.mxu0 %v1053_v45 }
 0x8fe   : > { %1649 = vpow2.f32 %v1036_v46 }
 0x8ff   : > { %v1140_v62 = vpop.permute.xlu1 %1139 }
 0x900   : > { %v1161_v2 = vsel %vm341_vm1, %v2043_v39, %v1140_v62  ;;  %v1407_v39 = vld [vmem:[%s2165_s3] ss:$0 sm:$0xff] }
 0x903   : > { %v1142_v63 = vpop.permute.xlu1 %1141 }
 0x904   : > { %v1162_v4 = vsel %vm341_vm1, %v2041_v38, %v1142_v63 }
 0x907   : > { %v1150_v0 = vpop.permute.xlu1 %1149 }
 0x908   : > { %v1164_v10 = vsel %vm427_vm2, %v1162_v4, %v1150_v0 }
 0x909   : > { %v1648_v6 = vpop.eup %1647 }
 0x90a   : > { %v1043_v47 = vsel %vm427_vm2, %v1648_v6, 0.0 }
 0x90b   : > { %v1650_v48 = vpop.eup %1649  ;;  %1044 = vadd.xlane.f32.xlu0 %v1043_v47 }
 0x90c   : > { %v1040_v49 = vsel %vm427_vm2, %v1650_v48, 0.0 }
 0x90f   : > { %1041 = vadd.xlane.f32.xlu0 %v1040_v49 }
 0x925   : > { %1050 = vrot.lane.b32.xlu0 %v2006_v7, %s1820_s28  ;;  %v1169_v7 = vld [vmem:[#allocation7 + $0x8] sm:$0xff] }
 0x929   : > { %1147 = vrot.lane.b32.xlu0 %v928_v33, %s1822_s12 }
 0x994   : > { %v1045_v50 = vpop.xlane.xlu0 %1044 }
 0x995   : > { %1651 = vrcp.f32 %v1045_v50 }
 0x998   : > { %v1042_v51 = vpop.xlane.xlu0 %1041 }
 0x999   : > { %1653 = vrcp.f32 %v1042_v51 }
 0x99c   : > { %v1051_v52 = vpop.permute.xlu0 %1050 }
 0x99d   : > { %1523 = vmatprep.subr.mxu0 %v1051_v52 }
 0x99e   : > { %1524 = vmatpush3.msra.mxu0 %v1051_v52 }
 0x99f   : > { %1528 = vmatprep.subr.mxu0 %v1171_v57 }
 0x9a0   : > { %v1148_v1 = vpop.permute.xlu0 %1147 }
 0x9a1   : > { %v1163_v5 = vsel %vm427_vm2, %v1161_v2, %v1148_v1 }
 0x9a2   : > { %v1652_v53 = vpop.eup %1651 }
 0x9a3   : > { %v1049_v56 = vmul.f32 %v1652_v53, %v1648_v6 }
 0x9a6   : > { %v1654_v54 = vpop.eup %1653 }
 0x9a7   : > { %v1048_v55 = vmul.f32 %v1654_v54, %v1650_v48 }
 0x9a9   : > { %1525 = vmatprep.mubr.msk.f32.mxu0 %vm427_vm2, %v1048_v55 }
 0x9aa   : > { %1526 = vmatmul.mubr.msk.f32.vlgmr.msra.gmra.mxu0 %vm427_vm2, %v1049_v56 }
 0x9ab   : > { %1529 = vmatpush3.msra.mxu0 %v1171_v57 }
 0x9ac   : > { %1530 = vmatprep.subr.mxu0 %v1170_v58 }
 0x9ad   : > { %1531 = vmatpush3.msra.mxu0 %v1170_v58 }
 0x9ae   : > { %1532 = vmatprep.subr.mxu0 %v1169_v7 }
 0x9af   : > { %1533 = vmatpush3.msra.mxu0 %v1169_v7 }
 0x9b0   : > { %1534 = vmatprep.subr.mxu0 %v1168_v59 }
 0x9b1   : > { %1535 = vmatpush3.msra.mxu0 %v1168_v59 }
 0xa6a   : > { %v1527_v60 = vpop.f32.mrf.mxu0 }
 0xa6b   : > { %1157 = vrot.lane.b32.xlu1 %v1527_v60, %s1823_s25 }
 0xa6c   : > { %v1128_v61 = vpop.f32.mrf.mxu0 }
 0xa6d   : > { %1155 = vrot.lane.b32.xlu0 %v1128_v61, %s1823_s25 }
 0xadd   : > { %v1158_v3 = vpop.permute.xlu1 %1157 }
 0xade   : > { %v1167_v13 = vsel %vm1165_vm3, %v1164_v10, %v1158_v3 }
 0xadf   : > { %v1156_v9 = vpop.permute.xlu0 %1155 }
 0xae0   : > { %v1166_v12 = vsel %vm1165_vm3, %v1163_v5, %v1156_v9 }
 0xae1   : > { %1536 = vmatprep.mubr.msk.f32.mxu0 %vm251_vm0, %v1166_v12 }
 0xae2   : > { %1537 = vmatmul.mubr.msk.f32.vlgmr.msra.gmra.mxu0 %vm251_vm0, %v1167_v13 }
 0xba2   : > { %v1538_v38 = vpop.f32.mrf.mxu0 }
 0xba3   : > { %v1257_v14 = vadd.f32 %v1538_v38, %v1407_v39 }
 0xba4   : > { %v1251_v15 = vpop.f32.mrf.mxu0 }
 0xba5   : > { %1261 = vst.msk [vmem:[%s244_s23 + $0x8] sm:$0xff] %vm251_vm0, %v1257_v14  ;;  %v1252_v16 = vadd.f32 %v1407_v39, %v1251_v15 }
 0xba7   : > { %1260 = vst.msk [vmem:[%s244_s23] sm:$0xff] %vm251_vm0, %v1252_v16 }
 0xba8   : > { %1748 = shalt.err (!%p1745_p3)
}
 0xba9   : > { %s1749_s28 = scalar_lea.hbm %s2117_s9, 256  ;;  %s1753_s8 = scalar_lea.hbm %s2166_s4, 512 }
 0xbaa   : > { %p1750_p11 = scmp.ne.s32.totalorder %s2117_s9, %s1749_s28  ;;  %p1754_p4 = scmp.lt.s32.totalorder %s2117_s9, %s2166_s4 }
 0xbab   : > { %p1755_p6 = scmp.lt.s32.totalorder %s1753_s8, %s1749_s28 }
 0xbac   : > { %p1751_p9 = pnand %p1750_p11, %p2181_p2 }
 0xbad   : > { %p1756_p8 = por %p1755_p6, %p1754_p4 }
 0xbae   : > { %p1752_p1 = pneg %p1751_p9 }
 0xbb0   : > { %p1757_p5 = pnand %p1756_p8, %p1752_p1 }
 0xbb2   : > { %1760 = shalt.err (!%p1757_p5)
}
 0xbb3   : > { %s1825_s5 = smov 128  }
 0xbb4   : > { %1549 = dma.vmem_to_hbm [thread:$0]  (%p2181_p2), %s2111_s30, 256, %s2117_s9, %s1263_s13, %s1825_s5, %s1825_s5, %s1821_s6  }
 0xbb5 PF: > { %s1291_s29 = sand.u32 1, %s1791_s15   ;;  %p2182_p7 = scmp.ne.s32.totalorder %s2172_s22, 0 }
 0xbb6   : > { %p2183_p12 = scmp.ge.s32.totalorder %s1803_s18, 2  ;;  %s1292_s7 = scalar_lea.sflag [#allocation4], %s1291_s29 }
 0xbb8   : > { %p1563_p13 = pnand %p2183_p12, %p2182_p7 }
 0xbba   : > { %p1564_p0 = pneg %p1563_p13 }
 0xbbc   : > { %1786 = dma.done.wait (%p1564_p0), %s1292_s7, 256  }
 0xbbd   : > { %1788 = vsyncadd (%p1564_p0), %s1292_s7, 4294967040  ;;  %p18_p10 = scmp.ge.s32.totalorder %s1929_s11, 4   ;;  %s2184_s15 = smov %s1795_s16 }
 0xbbe   : > { %s2185_s16 = smov %s1799_s17  ;;  %s2186_s17 = smov %s1945_s20 }
 0xbbf   : > { %s2187_s18 = smov %s1929_s11  ;;  %20 = sbr.rel (!%p18_p10) target bundleno = 6 (0x6), region = 89 }
 0xbc4   :  { %1297 = vsyncpa [#allocation3], 1 }
 0xbc5   :  { %1299 = vsyncpa [#allocation3 + $0x1], 1 }
 0xbc6   :  { %1300 = vsyncpa [#allocation6], 1 }
 0xbc7   :  { %1301 = vsyncpa [#allocation4], 1 }
 0xbc8   :  { %1303 = vsyncpa [#allocation4 + $0x1], 1 }

</bundles_post_ra>
